<compile_context>
chip_gen: v6e
topology: v6e:2x2x1
jax: 0.10.0
libtpu: 0.0.40
codegen_flags: <defaults>
</compile_context>

<pallas_src>
import functools

import jax
import jax.numpy as jnp
from jax.experimental import pallas as pl
from jax.experimental.pallas import tpu as pltpu

INPUT_SIZE = 38  # fixed by the module
OUT_LANES = 128  # packed output lane width


def _model_kernel(
    x_ref,               # (T, I)      encoder inputs (B == 1, squeezed)
    w_ih_e_ref,          # (I, D)      encoder RNN input weights (transposed)
    w_hh_e_ref,          # (D, D)      encoder RNN hidden weights (transposed)
    b_e_ref,             # (1, D)      encoder b_ih + b_hh
    w_ms_ref,            # (D, 2D)     [fc_mu_z | fc_sigma_z] weights (transposed, fused)
    b_ms_ref,            # (1, 2D)     fused biases
    mu_c_ref,            # (K, D)
    log_sigma_sq_c_ref,  # (K, D)
    eps_ref,             # (1, D)      pre-sampled N(0,1) noise (torch.randn_like)
    w_ih_d_ref,          # (D, I)      decoder RNN input weights (transposed)
    b_d_ref,             # (1, I)      decoder b_ih + b_hh
    out_ref,             # (4, 128)    packed outputs: row0 dec_out[0:I], row1 latent[0:D],
                         #             row2 gaussian loss [0:1], row3 uniform loss [0:1]
):
    T, I = x_ref.shape
    D = w_hh_e_ref.shape[0]
    K = mu_c_ref.shape[0]

    w_hh_e = w_hh_e_ref[...]

    # --- encoder RNN (tanh, h0 = 0) ---
    # Input projection hoisted out of the serial recurrence: one MXU pass for all T steps.
    xw = (
        jnp.dot(x_ref[...], w_ih_e_ref[...], preferred_element_type=jnp.float32)
        + b_e_ref[...]
    )  # (T, D), bias already folded in

    # Fully-unrolled recurrence (T is small & static). t == 0: h0 == 0 so skip h @ W_hh.
    h = jnp.tanh(xw[0:1, :])
    for t in range(1, T):
        h = jnp.tanh(
            xw[t : t + 1, :]
            + jnp.dot(h, w_hh_e, preferred_element_type=jnp.float32)
        )
    # h == encoder_hidden, shape (1, D)

    # --- LatentGaussianMixture.post_sample(encoder_hidden, return_loss=True) ---
    # fused fc_mu_z / fc_sigma_z: single (1,D)@(D,2D) matmul, split by lane slices.
    ms = jnp.dot(h, w_ms_ref[...], preferred_element_type=jnp.float32) + b_ms_ref[...]
    mu_z = ms[:, 0:D]                 # (1, D)
    log_sigma_sq_z = ms[:, D:2 * D]   # (1, D)

    sigma_z = jnp.exp(0.5 * log_sigma_sq_z)        # == sqrt(exp(log_sigma_sq_z))
    latent_z = mu_z + sigma_z * eps_ref[...]       # (1, D)

    mu_c = mu_c_ref[...]                           # (K, D)
    lsc = log_sigma_sq_c_ref[...]                  # (K, D)
    inv_exp_lsc = jnp.exp(-lsc)                    # (K, D), reused twice (no divides)

    # pi_post (B == 1 -> broadcast (1, D) against (K, D))
    diff_z = latent_z - mu_c                                                 # (K, D)
    logits = -jnp.sum(diff_z * diff_z * inv_exp_lsc, axis=-1, keepdims=True)  # (K, 1)
    m = jnp.max(logits, axis=0, keepdims=True)
    e = jnp.exp(logits - m)
    pi_post = e / jnp.sum(e, axis=0, keepdims=True) + 1e-10                  # (K, 1)

    # gaussian loss terms
    a = lsc + jnp.exp(log_sigma_sq_z - lsc)                                  # (K, D)
    diff_mu = mu_z - mu_c
    b = diff_mu * diff_mu * inv_exp_lsc                                      # (K, D)
    c = a + b
    d = 0.5 * jnp.mean(1.0 + log_sigma_sq_z, axis=-1, keepdims=True)         # (1, 1)

    total = jnp.sum(jnp.sum(c * pi_post, axis=1, keepdims=True), axis=0, keepdims=True)
    gauss = 0.5 * total - d                                                  # (1, 1)

    val = pi_post * jnp.log(pi_post)                                         # (K, 1)
    uniform = jnp.sum(val, axis=0, keepdims=True) * (1.0 / K)                # (1, 1)

    # --- decoder RNN: sequence length 1, h0 = 0 (so the W_hh term vanishes) ---
    dec_out = jnp.tanh(
        jnp.dot(h, w_ih_d_ref[...], preferred_element_type=jnp.float32) + b_d_ref[...]
    )  # (1, I)

    # --- pack all outputs into one VMEM tile (single writeback DMA) ---
    out_ref[...] = jnp.zeros(out_ref.shape, jnp.float32)
    out_ref[0:1, 0:I] = dec_out
    out_ref[1:2, 0:D] = latent_z
    out_ref[2:3, 0:1] = gauss
    out_ref[3:4, 0:1] = uniform


@functools.partial(jax.jit)
def model_forward(x, params, eps):
    """x: (B, T, INPUT_SIZE) batch_first, like the PyTorch module (B must be 1)."""
    B, T, I = x.shape
    D = params["w_hh_e"].shape[0]
    assert B == 1, "PyTorch reference broadcasting in post_sample requires batch == 1"
    assert I <= OUT_LANES and D <= OUT_LANES

    x2d = x.reshape(T, I).astype(jnp.float32)  # B == 1: no transpose needed

    inputs = (
        x2d,
        params["w_ih_e"], params["w_hh_e"], params["b_e"],
        params["w_musig"], params["b_musig"],
        params["mu_c"], params["log_sigma_sq_c"], eps,
        params["w_ih_d"], params["b_d"],
    )
    vmem = pl.BlockSpec(memory_space=pltpu.MemorySpace.VMEM)
    packed = pl.pallas_call(
        _model_kernel,
        out_shape=jax.ShapeDtypeStruct((4, OUT_LANES), jnp.float32),
        in_specs=[vmem] * len(inputs),
        out_specs=vmem,
    )(*inputs)

    decoder_outputs = packed[0, 0:I].reshape(B, 1, I)     # (B, 1, 38) like nn.RNN output
    latent_z = packed[1, 0:D].reshape(1, B, D)            # (1, B, D), same rank as encoder_hidden
    batch_gaussian_loss = packed[2, 0:1].reshape(1, 1)    # (1, 1), matches torch for B == 1
    batch_uniform_loss = packed[3, 0]                     # scalar
    return decoder_outputs, batch_gaussian_loss, batch_uniform_loss, latent_z


def init_params(key, input_size, rnn_dim, cluster_num):
    D, I, K = rnn_dim, input_size, cluster_num
    ks = jax.random.split(key, 10)
    enc_s = 1.0 / float(D) ** 0.5   # PyTorch nn.RNN default: U(-1/sqrt(hidden), 1/sqrt(hidden))
    dec_s = 1.0 / float(I) ** 0.5

    def u(k, shape, s):
        return jax.random.uniform(k, shape, jnp.float32, -s, s)

    # fc_mu_z / fc_sigma_z: Linear(D, D), normal(std=0.02), bias 0; stored transposed
    # and fused as [w_mu | w_sig] -> (D, 2D) so the kernel does a single matmul.
    w_mu = 0.02 * jax.random.normal(ks[4], (D, D), jnp.float32)
    w_sig = 0.02 * jax.random.normal(ks[5], (D, D), jnp.float32)

    return dict(
        # encoder nn.RNN(38, D): weights stored transposed as (in, out)
        w_ih_e=u(ks[0], (I, D), enc_s),
        w_hh_e=u(ks[1], (D, D), enc_s),
        b_e=u(ks[2], (1, D), enc_s) + u(ks[3], (1, D), enc_s),
        # fused latent projections
        w_musig=jnp.concatenate([w_mu, w_sig], axis=1),      # (D, 2D)
        b_musig=jnp.zeros((1, 2 * D), jnp.float32),
        # mixture params
        mu_c=jax.random.uniform(ks[6], (K, D), jnp.float32),  # torch.rand
        log_sigma_sq_c=jnp.zeros((K, D), jnp.float32),
        # decoder nn.RNN(D, 38)
        w_ih_d=u(ks[7], (D, I), dec_s),
        b_d=u(ks[8], (1, I), dec_s) + u(ks[9], (1, I), dec_s),
    )


if __name__ == "__main__":
    key = jax.random.PRNGKey(0)
    B, T = 1, 8            # batch must be 1 (PyTorch post_sample broadcasting)
    rnn_dim = 32           # args.x_latent_size == args.rnn_dim
    cluster_num = 8        # args.cluster_num

    k_p, k_x, k_eps = jax.random.split(key, 3)
    params = init_params(k_p, INPUT_SIZE, rnn_dim, cluster_num)
    x = jax.random.normal(k_x, (B, T, INPUT_SIZE), jnp.float32)
    # torch.randn_like eps, pre-sampled on host and fed to the kernel deterministically
    eps = jax.random.normal(k_eps, (B, rnn_dim), jnp.float32)

    outs = model_forward(x, params, eps)
    jax.block_until_ready(outs)
    print("KERNEL_OK")
</pallas_src>

<mosaic_0001>
module attributes {stable_mosaic.version = 11 : i64} {
  func.func @_model_kernel(%arg0: memref<8x38xf32, #tpu.memory_space<vmem>>, %arg1: memref<38x32xf32, #tpu.memory_space<vmem>>, %arg2: memref<32x32xf32, #tpu.memory_space<vmem>>, %arg3: memref<1x32xf32, #tpu.memory_space<vmem>>, %arg4: memref<32x64xf32, #tpu.memory_space<vmem>>, %arg5: memref<1x64xf32, #tpu.memory_space<vmem>>, %arg6: memref<8x32xf32, #tpu.memory_space<vmem>>, %arg7: memref<8x32xf32, #tpu.memory_space<vmem>>, %arg8: memref<1x32xf32, #tpu.memory_space<vmem>>, %arg9: memref<32x38xf32, #tpu.memory_space<vmem>>, %arg10: memref<1x38xf32, #tpu.memory_space<vmem>>, %arg11: memref<4x128xf32, #tpu.memory_space<vmem>>) attributes {dimension_semantics = [], scalar_prefetch = 0 : i64, scratch_operands = 0 : i64, tpu.core_type = #tpu.core_type<tc>} {
    %c0 = arith.constant 0 : index
    %c0_0 = arith.constant 0 : index
    %0 = vector.load %arg2[%c0, %c0_0] : memref<32x32xf32, #tpu.memory_space<vmem>>, vector<32x32xf32>
    %c0_1 = arith.constant 0 : index
    %c0_2 = arith.constant 0 : index
    %1 = vector.load %arg0[%c0_1, %c0_2] : memref<8x38xf32, #tpu.memory_space<vmem>>, vector<8x38xf32>
    %c0_3 = arith.constant 0 : index
    %c0_4 = arith.constant 0 : index
    %2 = vector.load %arg1[%c0_3, %c0_4] : memref<38x32xf32, #tpu.memory_space<vmem>>, vector<38x32xf32>
    %cst = arith.constant dense<0.000000e+00> : vector<8x32xf32>
    %3 = tpu.matmul %1, %2, %cst {dimension_numbers = #tpu.dot_dimension_numbers<[1], [0], [0], [1], [0, 0, 1, 1], [], []>} : vector<8x38xf32>, vector<38x32xf32>, vector<8x32xf32> -> vector<8x32xf32>
    %c0_5 = arith.constant 0 : index
    %c0_6 = arith.constant 0 : index
    %4 = vector.load %arg3[%c0_5, %c0_6] : memref<1x32xf32, #tpu.memory_space<vmem>>, vector<1x32xf32>
    %5 = vector.broadcast %4 : vector<1x32xf32> to vector<8x32xf32>
    %6 = arith.addf %3, %5 : vector<8x32xf32>
    %7 = vector.extract_strided_slice %6 {offsets = [0, 0], sizes = [1, 32], strides = [1, 1]} : vector<8x32xf32> to vector<1x32xf32>
    %8 = math.tanh %7 : vector<1x32xf32>
    %9 = vector.extract_strided_slice %6 {offsets = [1, 0], sizes = [1, 32], strides = [1, 1]} : vector<8x32xf32> to vector<1x32xf32>
    %cst_7 = arith.constant dense<0.000000e+00> : vector<1x32xf32>
    %10 = tpu.matmul %8, %0, %cst_7 {dimension_numbers = #tpu.dot_dimension_numbers<[1], [0], [0], [1], [0, 0, 1, 1], [], []>} : vector<1x32xf32>, vector<32x32xf32>, vector<1x32xf32> -> vector<1x32xf32>
    %11 = arith.addf %9, %10 : vector<1x32xf32>
    %12 = math.tanh %11 : vector<1x32xf32>
    %13 = vector.extract_strided_slice %6 {offsets = [2, 0], sizes = [1, 32], strides = [1, 1]} : vector<8x32xf32> to vector<1x32xf32>
    %cst_8 = arith.constant dense<0.000000e+00> : vector<1x32xf32>
    %14 = tpu.matmul %12, %0, %cst_8 {dimension_numbers = #tpu.dot_dimension_numbers<[1], [0], [0], [1], [0, 0, 1, 1], [], []>} : vector<1x32xf32>, vector<32x32xf32>, vector<1x32xf32> -> vector<1x32xf32>
    %15 = arith.addf %13, %14 : vector<1x32xf32>
    %16 = math.tanh %15 : vector<1x32xf32>
    %17 = vector.extract_strided_slice %6 {offsets = [3, 0], sizes = [1, 32], strides = [1, 1]} : vector<8x32xf32> to vector<1x32xf32>
    %cst_9 = arith.constant dense<0.000000e+00> : vector<1x32xf32>
    %18 = tpu.matmul %16, %0, %cst_9 {dimension_numbers = #tpu.dot_dimension_numbers<[1], [0], [0], [1], [0, 0, 1, 1], [], []>} : vector<1x32xf32>, vector<32x32xf32>, vector<1x32xf32> -> vector<1x32xf32>
    %19 = arith.addf %17, %18 : vector<1x32xf32>
    %20 = math.tanh %19 : vector<1x32xf32>
    %21 = vector.extract_strided_slice %6 {offsets = [4, 0], sizes = [1, 32], strides = [1, 1]} : vector<8x32xf32> to vector<1x32xf32>
    %cst_10 = arith.constant dense<0.000000e+00> : vector<1x32xf32>
    %22 = tpu.matmul %20, %0, %cst_10 {dimension_numbers = #tpu.dot_dimension_numbers<[1], [0], [0], [1], [0, 0, 1, 1], [], []>} : vector<1x32xf32>, vector<32x32xf32>, vector<1x32xf32> -> vector<1x32xf32>
    %23 = arith.addf %21, %22 : vector<1x32xf32>
    %24 = math.tanh %23 : vector<1x32xf32>
    %25 = vector.extract_strided_slice %6 {offsets = [5, 0], sizes = [1, 32], strides = [1, 1]} : vector<8x32xf32> to vector<1x32xf32>
    %cst_11 = arith.constant dense<0.000000e+00> : vector<1x32xf32>
    %26 = tpu.matmul %24, %0, %cst_11 {dimension_numbers = #tpu.dot_dimension_numbers<[1], [0], [0], [1], [0, 0, 1, 1], [], []>} : vector<1x32xf32>, vector<32x32xf32>, vector<1x32xf32> -> vector<1x32xf32>
    %27 = arith.addf %25, %26 : vector<1x32xf32>
    %28 = math.tanh %27 : vector<1x32xf32>
    %29 = vector.extract_strided_slice %6 {offsets = [6, 0], sizes = [1, 32], strides = [1, 1]} : vector<8x32xf32> to vector<1x32xf32>
    %cst_12 = arith.constant dense<0.000000e+00> : vector<1x32xf32>
    %30 = tpu.matmul %28, %0, %cst_12 {dimension_numbers = #tpu.dot_dimension_numbers<[1], [0], [0], [1], [0, 0, 1, 1], [], []>} : vector<1x32xf32>, vector<32x32xf32>, vector<1x32xf32> -> vector<1x32xf32>
    %31 = arith.addf %29, %30 : vector<1x32xf32>
    %32 = math.tanh %31 : vector<1x32xf32>
    %33 = vector.extract_strided_slice %6 {offsets = [7, 0], sizes = [1, 32], strides = [1, 1]} : vector<8x32xf32> to vector<1x32xf32>
    %cst_13 = arith.constant dense<0.000000e+00> : vector<1x32xf32>
    %34 = tpu.matmul %32, %0, %cst_13 {dimension_numbers = #tpu.dot_dimension_numbers<[1], [0], [0], [1], [0, 0, 1, 1], [], []>} : vector<1x32xf32>, vector<32x32xf32>, vector<1x32xf32> -> vector<1x32xf32>
    %35 = arith.addf %33, %34 : vector<1x32xf32>
    %36 = math.tanh %35 : vector<1x32xf32>
    %c0_14 = arith.constant 0 : index
    %c0_15 = arith.constant 0 : index
    %37 = vector.load %arg4[%c0_14, %c0_15] : memref<32x64xf32, #tpu.memory_space<vmem>>, vector<32x64xf32>
    %cst_16 = arith.constant dense<0.000000e+00> : vector<1x64xf32>
    %38 = tpu.matmul %36, %37, %cst_16 {dimension_numbers = #tpu.dot_dimension_numbers<[1], [0], [0], [1], [0, 0, 1, 1], [], []>} : vector<1x32xf32>, vector<32x64xf32>, vector<1x64xf32> -> vector<1x64xf32>
    %c0_17 = arith.constant 0 : index
    %c0_18 = arith.constant 0 : index
    %39 = vector.load %arg5[%c0_17, %c0_18] : memref<1x64xf32, #tpu.memory_space<vmem>>, vector<1x64xf32>
    %40 = arith.addf %38, %39 : vector<1x64xf32>
    %41 = vector.extract_strided_slice %40 {offsets = [0, 0], sizes = [1, 32], strides = [1, 1]} : vector<1x64xf32> to vector<1x32xf32>
    %42 = vector.extract_strided_slice %40 {offsets = [0, 32], sizes = [1, 32], strides = [1, 1]} : vector<1x64xf32> to vector<1x32xf32>
    %cst_19 = arith.constant 5.000000e-01 : f32
    %43 = vector.broadcast %cst_19 : f32 to vector<1x32xf32>
    %44 = arith.mulf %43, %42 : vector<1x32xf32>
    %45 = math.exp %44 : vector<1x32xf32>
    %c0_20 = arith.constant 0 : index
    %c0_21 = arith.constant 0 : index
    %46 = vector.load %arg8[%c0_20, %c0_21] : memref<1x32xf32, #tpu.memory_space<vmem>>, vector<1x32xf32>
    %47 = arith.mulf %45, %46 : vector<1x32xf32>
    %48 = arith.addf %41, %47 : vector<1x32xf32>
    %c0_22 = arith.constant 0 : index
    %c0_23 = arith.constant 0 : index
    %49 = vector.load %arg6[%c0_22, %c0_23] : memref<8x32xf32, #tpu.memory_space<vmem>>, vector<8x32xf32>
    %c0_24 = arith.constant 0 : index
    %c0_25 = arith.constant 0 : index
    %50 = vector.load %arg7[%c0_24, %c0_25] : memref<8x32xf32, #tpu.memory_space<vmem>>, vector<8x32xf32>
    %cst_26 = arith.constant 0.000000e+00 : f32
    %51 = vector.broadcast %cst_26 : f32 to vector<8x32xf32>
    %52 = arith.subf %51, %50 : vector<8x32xf32>
    %53 = math.exp %52 : vector<8x32xf32>
    %54 = vector.broadcast %48 : vector<1x32xf32> to vector<8x32xf32>
    %55 = arith.subf %54, %49 : vector<8x32xf32>
    %56 = arith.mulf %55, %55 : vector<8x32xf32>
    %57 = arith.mulf %56, %53 : vector<8x32xf32>
    %cst_27 = arith.constant dense<0.000000e+00> : vector<8xf32>
    %58 = vector.multi_reduction <add>, %57, %cst_27 [1] : vector<8x32xf32> to vector<8xf32>
    %59 = vector.shape_cast %58 : vector<8xf32> to vector<8x1xf32>
    %cst_28 = arith.constant 0.000000e+00 : f32
    %60 = vector.broadcast %cst_28 : f32 to vector<8x1xf32>
    %61 = arith.subf %60, %59 : vector<8x1xf32>
    %cst_29 = arith.constant dense<0xFF800000> : vector<1xf32>
    %62 = vector.multi_reduction <maximumf>, %61, %cst_29 [0] : vector<8x1xf32> to vector<1xf32>
    %63 = vector.shape_cast %62 : vector<1xf32> to vector<1x1xf32>
    %64 = vector.broadcast %63 : vector<1x1xf32> to vector<8x1xf32>
    %65 = arith.subf %61, %64 : vector<8x1xf32>
    %66 = math.exp %65 : vector<8x1xf32>
    %cst_30 = arith.constant dense<0.000000e+00> : vector<1xf32>
    %67 = vector.multi_reduction <add>, %66, %cst_30 [0] : vector<8x1xf32> to vector<1xf32>
    %68 = vector.shape_cast %67 : vector<1xf32> to vector<1x1xf32>
    %69 = vector.broadcast %68 : vector<1x1xf32> to vector<8x1xf32>
    %70 = arith.divf %66, %69 : vector<8x1xf32>
    %cst_31 = arith.constant 1.000000e-10 : f32
    %71 = vector.broadcast %cst_31 : f32 to vector<8x1xf32>
    %72 = arith.addf %70, %71 : vector<8x1xf32>
    %73 = vector.broadcast %42 : vector<1x32xf32> to vector<8x32xf32>
    %74 = arith.subf %73, %50 : vector<8x32xf32>
    %75 = math.exp %74 : vector<8x32xf32>
    %76 = arith.addf %50, %75 : vector<8x32xf32>
    %77 = vector.broadcast %41 : vector<1x32xf32> to vector<8x32xf32>
    %78 = arith.subf %77, %49 : vector<8x32xf32>
    %79 = arith.mulf %78, %78 : vector<8x32xf32>
    %80 = arith.mulf %79, %53 : vector<8x32xf32>
    %81 = arith.addf %76, %80 : vector<8x32xf32>
    %cst_32 = arith.constant 1.000000e+00 : f32
    %82 = vector.broadcast %cst_32 : f32 to vector<1x32xf32>
    %83 = arith.addf %82, %42 : vector<1x32xf32>
    %cst_33 = arith.constant dense<0.000000e+00> : vector<1xf32>
    %84 = vector.multi_reduction <add>, %83, %cst_33 [1] : vector<1x32xf32> to vector<1xf32>
    %85 = vector.shape_cast %84 : vector<1xf32> to vector<1x1xf32>
    %cst_34 = arith.constant 3.200000e+01 : f32
    %86 = vector.broadcast %cst_34 : f32 to vector<1x1xf32>
    %87 = arith.divf %85, %86 : vector<1x1xf32>
    %cst_35 = arith.constant 5.000000e-01 : f32
    %88 = vector.broadcast %cst_35 : f32 to vector<1x1xf32>
    %89 = arith.mulf %88, %87 : vector<1x1xf32>
    %90 = vector.broadcast %72 : vector<8x1xf32> to vector<8x32xf32>
    %91 = arith.mulf %81, %90 : vector<8x32xf32>
    %cst_36 = arith.constant dense<0.000000e+00> : vector<8xf32>
    %92 = vector.multi_reduction <add>, %91, %cst_36 [1] : vector<8x32xf32> to vector<8xf32>
    %93 = vector.shape_cast %92 : vector<8xf32> to vector<8x1xf32>
    %cst_37 = arith.constant dense<0.000000e+00> : vector<1xf32>
    %94 = vector.multi_reduction <add>, %93, %cst_37 [0] : vector<8x1xf32> to vector<1xf32>
    %95 = vector.shape_cast %94 : vector<1xf32> to vector<1x1xf32>
    %cst_38 = arith.constant 5.000000e-01 : f32
    %96 = vector.broadcast %cst_38 : f32 to vector<1x1xf32>
    %97 = arith.mulf %96, %95 : vector<1x1xf32>
    %98 = arith.subf %97, %89 : vector<1x1xf32>
    %99 = math.log %72 : vector<8x1xf32>
    %100 = arith.mulf %72, %99 : vector<8x1xf32>
    %cst_39 = arith.constant dense<0.000000e+00> : vector<1xf32>
    %101 = vector.multi_reduction <add>, %100, %cst_39 [0] : vector<8x1xf32> to vector<1xf32>
    %102 = vector.shape_cast %101 : vector<1xf32> to vector<1x1xf32>
    %cst_40 = arith.constant 1.250000e-01 : f32
    %103 = vector.broadcast %cst_40 : f32 to vector<1x1xf32>
    %104 = arith.mulf %102, %103 : vector<1x1xf32>
    %c0_41 = arith.constant 0 : index
    %c0_42 = arith.constant 0 : index
    %105 = vector.load %arg9[%c0_41, %c0_42] : memref<32x38xf32, #tpu.memory_space<vmem>>, vector<32x38xf32>
    %cst_43 = arith.constant dense<0.000000e+00> : vector<1x38xf32>
    %106 = tpu.matmul %36, %105, %cst_43 {dimension_numbers = #tpu.dot_dimension_numbers<[1], [0], [0], [1], [0, 0, 1, 1], [], []>} : vector<1x32xf32>, vector<32x38xf32>, vector<1x38xf32> -> vector<1x38xf32>
    %c0_44 = arith.constant 0 : index
    %c0_45 = arith.constant 0 : index
    %107 = vector.load %arg10[%c0_44, %c0_45] : memref<1x38xf32, #tpu.memory_space<vmem>>, vector<1x38xf32>
    %108 = arith.addf %106, %107 : vector<1x38xf32>
    %109 = math.tanh %108 : vector<1x38xf32>
    %cst_46 = arith.constant 0.000000e+00 : f32
    %110 = vector.broadcast %cst_46 : f32 to vector<4x128xf32>
    %c0_47 = arith.constant 0 : index
    %c0_48 = arith.constant 0 : index
    %111 = vector.load %arg11[%c0_47, %c0_48] : memref<4x128xf32, #tpu.memory_space<vmem>>, vector<4x128xf32>
    tpu.vector_store %arg11[%c0_47, %c0_48], %110 {strides = array<i32>} : memref<4x128xf32, #tpu.memory_space<vmem>>, vector<4x128xf32>,
    %c0_49 = arith.constant 0 : index
    %c0_50 = arith.constant 0 : index
    %112 = vector.load %arg11[%c0_49, %c0_50] : memref<4x128xf32, #tpu.memory_space<vmem>>, vector<1x38xf32>
    tpu.vector_store %arg11[%c0_49, %c0_50], %109 {strides = array<i32>} : memref<4x128xf32, #tpu.memory_space<vmem>>, vector<1x38xf32>,
    %c1 = arith.constant 1 : index
    %c0_51 = arith.constant 0 : index
    %113 = vector.load %arg11[%c1, %c0_51] : memref<4x128xf32, #tpu.memory_space<vmem>>, vector<1x32xf32>
    tpu.vector_store %arg11[%c1, %c0_51], %48 {strides = array<i32>} : memref<4x128xf32, #tpu.memory_space<vmem>>, vector<1x32xf32>,
    %c2 = arith.constant 2 : index
    %c0_52 = arith.constant 0 : index
    %114 = vector.load %arg11[%c2, %c0_52] : memref<4x128xf32, #tpu.memory_space<vmem>>, vector<1x1xf32>
    tpu.vector_store %arg11[%c2, %c0_52], %98 {strides = array<i32>} : memref<4x128xf32, #tpu.memory_space<vmem>>, vector<1x1xf32>,
    %c3 = arith.constant 3 : index
    %c0_53 = arith.constant 0 : index
    %115 = vector.load %arg11[%c3, %c0_53] : memref<4x128xf32, #tpu.memory_space<vmem>>, vector<1x1xf32>
    tpu.vector_store %arg11[%c3, %c0_53], %104 {strides = array<i32>} : memref<4x128xf32, #tpu.memory_space<vmem>>, vector<1x1xf32>,
    return
  }
}

</mosaic_0001>

<bundles_post_ra>
// kernel: model_forward.1
= control target key start
LH: loop header
LB: loop body
LE: loop exit
PB: predicated region body
PF: predicated region fallthrough
CT: control target
= control target key end

     0   :  { %16 = vsyncpa [#allocation3], 0  ;;  %s1582_s0 = inlined_call_operand.vmem [shape: f32[8,38], index: 0, kind: input, shape index: {}]   ;;  %s1583_s1 = inlined_call_operand.vmem [shape: f32[38,32], index: 1, kind: input, shape index: {}]   ;;  %s1584_s2 = inlined_call_operand.vmem [shape: f32[32,32], index: 2, kind: input, shape index: {}]   ;;  %s1585_s3 = inlined_call_operand.vmem [shape: f32[1,32], index: 3, kind: input, shape index: {}]   ;;  %s1586_s4 = inlined_call_operand.vmem [shape: f32[32,64], index: 4, kind: input, shape index: {}]   ;;  %s1587_s5 = inlined_call_operand.hbm [shape: f32[1,64], index: 5, kind: input, shape index: {}]   ;;  %s1588_s6 = inlined_call_operand.vmem [shape: f32[8,32], index: 6, kind: input, shape index: {}]   ;;  %s1589_s7 = inlined_call_operand.hbm [shape: f32[8,32], index: 7, kind: input, shape index: {}]   ;;  %s1590_s8 = inlined_call_operand.vmem [shape: f32[1,32], index: 8, kind: input, shape index: {}]   ;;  %s1591_s9 = inlined_call_operand.hbm [shape: f32[32,38], index: 9, kind: input, shape index: {}]   ;;  %s1592_s10 = inlined_call_operand.hbm [shape: f32[1,38], index: 10, kind: input, shape index: {}]   ;;  %s1593_s11 = inlined_call_operand.vmem [shape: f32[4,128], index: 11, kind: output, shape index: {}]  }
   0x1   :  { %17 = vsyncpa [#allocation5], 0 }
   0x2   :  { %18 = vsyncpa [#allocation8], 0  ;;  %s1313_s17 = smov [#allocation4]   ;;  %s1314_s19 = smov [#allocation2]  }
   0x3   :  { %s47_s18 = sshll.u32 %s1313_s17, 4  ;;  %s35_s20 = sshll.u32 %s1314_s19, 4  ;;  %s48_s18 = int_to_ptr.vmem [resolvable:$true] %s47_s18  ;;  %s36_s20 = int_to_ptr.vmem [resolvable:$true] %s35_s20 }
   0x4   :  { %s1235_s21 = scalar_lea.vmem %s48_s18, 128  ;;  %p1240_p1 = scmp.lt.s32.totalorder %s48_s18, %s48_s18 }
   0x5   :  { %p1236_p0 = scmp.ne.s32.totalorder %s48_s18, %s1235_s21  ;;  %p1241_p2 = scmp.lt.s32.totalorder %s1235_s21, %s1235_s21 }
   0x7   :  { %p1242_p3 = por %p1241_p2, %p1240_p1 }
   0x9   :  { %p1243_p4 = pnand %p1242_p3, %p1236_p0 }
   0xb   :  { %1246 = shalt.err (!%p1243_p4)
}
   0xc   :  { %50 = dma.hbm_to_vmem [thread:$0]  %s1589_s7, 128, %s48_s18, [#allocation5]  }
   0xd   :  { %s1255_s24 = scalar_lea.vmem %s36_s20, 16  ;;  %s1259_s25 = scalar_lea.vmem %s36_s20, 32 }
   0xe   :  { %p1256_p5 = scmp.ne.s32.totalorder %s36_s20, %s1255_s24  ;;  %p1260_p6 = scmp.lt.s32.totalorder %s36_s20, %s36_s20 }
   0xf   :  { %p1261_p7 = scmp.lt.s32.totalorder %s1259_s25, %s1255_s24 }
  0x11   :  { %p1262_p8 = por %p1261_p7, %p1260_p6 }
  0x13   :  { %p1263_p9 = pnand %p1262_p8, %p1256_p5 }
  0x15   :  { %1266 = shalt.err (!%p1263_p9)
}
  0x16   :  { %38 = dma.hbm_to_vmem [thread:$0]  %s1587_s5, 16, %s36_s20, [#allocation3]  }
  0x17   :  { %s1315_s28 = smov [#allocation6]  }
  0x18   :  { %s58_s29 = sshll.u32 %s1315_s28, 4  ;;  %s59_s29 = int_to_ptr.vmem [resolvable:$true] %s58_s29 }
  0x19   :  { %s1275_s30 = scalar_lea.vmem %s59_s29, 512  ;;  %p1280_p11 = scmp.lt.s32.totalorder %s59_s29, %s59_s29 }
  0x1a   :  { %p1276_p10 = scmp.ne.s32.totalorder %s59_s29, %s1275_s30  ;;  %p1281_p12 = scmp.lt.s32.totalorder %s1275_s30, %s1275_s30 }
  0x1c   :  { %p1282_p13 = por %p1281_p12, %p1280_p11 }
  0x1e   :  { %p1283_p0 = pnand %p1282_p13, %p1276_p10 }
  0x20   :  { %1286 = shalt.err (!%p1283_p0)
}
  0x21   :  { %s1316_s7 = smov 128   ;;  %s1317_s12 = smov 8  }
  0x22   :  { %64 = dma.hbm_to_vmem [thread:$0]  %s1591_s9, 512, %s59_s29, [#allocation5], %s1316_s7, %s1316_s7, %s1317_s12  }
  0x23   :  { %s1318_s15 = smov [#allocation7]  }
  0x24   :  { %s71_s16 = sshll.u32 %s1318_s15, 4  ;;  %s72_s16 = int_to_ptr.vmem [resolvable:$true] %s71_s16 }
  0x25   :  { %s1295_s5 = scalar_lea.vmem %s72_s16, 16  ;;  %s1299_s17 = scalar_lea.vmem %s72_s16, 32 }
  0x26   :  { %p1296_p1 = scmp.ne.s32.totalorder %s72_s16, %s1295_s5  ;;  %p1300_p2 = scmp.lt.s32.totalorder %s72_s16, %s72_s16 }
  0x27   :  { %p1301_p3 = scmp.lt.s32.totalorder %s1299_s17, %s1295_s5 }
  0x29   :  { %p1302_p4 = por %p1301_p3, %p1300_p2 }
  0x2b   :  { %p1303_p5 = pnand %p1302_p4, %p1296_p1 }
  0x2d   :  { %1306 = shalt.err (!%p1303_p5)
}
  0x2e   :  { %74 = dma.hbm_to_vmem [thread:$0]  %s1592_s10, 16, %s72_s16, [#allocation8]  }
  0x2f   :  { %1307 = dma.done.wait [#allocation3], 16  }
  0x30   :  { %1308 = vsyncadd [#allocation3], 4294967280 }
  0x31   :  { %1309 = dma.done.wait [#allocation5], 640  }
  0x32   :  { %1310 = vsyncadd [#allocation5], 4294966656 }
  0x33   :  { %1311 = dma.done.wait [#allocation8], 16  }
  0x34   :  { %1312 = vsyncadd [#allocation8], 4294967280  ;;  %v1319_v0 = vmov 0.0   ;;  %vm1320_vm0 = vmmov 0   ;;  %vm108_vm1 = vcmask 1045504   ;;  %v95_v2 = vld [vmem:[%s1583_s1 + $0x18] sm:$0xff] }
  0x35   :  { %1075 = vmatprep.subr.mxu0 %v1319_v0  ;;  %997 = vst [vmem:[%s1593_s11] sm:$0xf] %v1319_v0  ;;  %1085 = vmatprep.mubr.msk.f32.mxu0 %vm1320_vm0, %v1319_v0  ;;  %v96_v1 = vld [vmem:[%s1583_s1 + $0x20] sm:$0x3f]  ;;  %v94_v3 = vld [vmem:[%s1583_s1 + $0x10] sm:$0xff]  ;;  %v93_v4 = vld [vmem:[%s1583_s1 + $0x8] sm:$0xff]  ;;  %vm104_vm2 = vcmask 310272  }
  0x36   :  { %1088 = vmatprep.subr.mxu1 %v1319_v0  ;;  %1096 = vmatprep.mubr.msk.f32.mxu1 %vm1320_vm0, %v1319_v0  ;;  %v92_v5 = vld [vmem:[%s1583_s1] sm:$0xff]  ;;  %v1433_v7 = vld [vmem:[%s1584_s2 + $0x18] sm:$0xff]  ;;  %v1438_v8 = vld [vmem:[%s1584_s2 + $0x10] sm:$0xff]  ;;  %vm183_vm3 = vcmask 261120   ;;  %s1321_s25 = smov 32   ;;  %vm998_vm4 = vcmask 303104  }
  0x37   :  { %1076 = vmatpush3.msk.msra.mxu0 %vm108_vm1, %v96_v1  ;;  %v91_v6 = vld [vmem:[%s1582_s0] sm:$0xff]  ;;  %1089 = vmatpush3.msra.mxu1 %v1433_v7  ;;  %v1446_v9 = vld [vmem:[%s1584_s2 + $0x8] sm:$0xff]  ;;  %v739_v52 = vld [vmem:[%s1586_s4 + $0x18] sm:$0xff]  ;;  %s1322_s26 = smov 96   ;;  %vm892_vm5 = vcmask 253952   ;;  %vm1001_vm6 = vcmask 0  }
  0x38   :  { %1077 = vmatprep.subr.mxu0 %v1319_v0  ;;  %1090 = vmatprep.subr.mxu1 %v1319_v0  ;;  %v1455_v10 = vld [vmem:[%s1584_s2] sm:$0xff]  ;;  %v738_v54 = vld [vmem:[%s1586_s4 + $0x10] sm:$0xff]  ;;  %v737_v56 = vld [vmem:[%s1586_s4 + $0x8] sm:$0xff] }
  0x39   :  { %1078 = vmatpush3.msra.mxu0 %v95_v2  ;;  %1091 = vmatpush3.msra.mxu1 %v1438_v8  ;;  %v1011_v11 = vld [vmem:[%s1585_s3] ss:$0 sm:$0xff]  ;;  %v924_v53 = vld [vmem:[#allocation6 + $0x18] sm:$0xff]  ;;  %v922_v57 = vld [vmem:[#allocation6 + $0x8] sm:$0xff] }
  0x3a   :  { %1079 = vmatprep.subr.mxu0 %v1319_v0  ;;  %1092 = vmatprep.subr.mxu1 %v1319_v0  ;;  %v923_v55 = vld [vmem:[#allocation6 + $0x10] sm:$0xff]  ;;  %v921_v59 = vld [vmem:[#allocation6] sm:$0xff]  ;;  %v834_v60 = vld [vmem:[#allocation4] sm:$0xff] }
  0x3b   :  { %1080 = vmatpush3.msra.mxu0 %v94_v3  ;;  %1093 = vmatpush3.msra.mxu1 %v1446_v9  ;;  %v736_v58 = vld [vmem:[%s1586_s4] sm:$0xff] }
  0x3c   :  { %1081 = vmatprep.subr.mxu0 %v1319_v0  ;;  %1094 = vmatprep.subr.mxu1 %v1319_v0  ;;  %v1022_v61 = vld [vmem:[%s1590_s8] ss:$0 sm:$0xff] }
  0x3d   :  { %1082 = vmatpush3.msra.mxu0 %v93_v4  ;;  %1095 = vmatpush3.msra.mxu1 %v1455_v10  ;;  %v838_v4 = vlaneseq }
  0x3e   :  { %1083 = vmatprep.subr.mxu0 %v1319_v0  ;;  %1099 = vmatprep.subr.mxu1 %v1319_v0 }
  0x3f   :  { %1084 = vmatpush3.msra.mxu0 %v92_v5  ;;  %872 = vrot.lane.b32.xlu1 %v834_v60, %s1321_s25  ;;  %v839_v5 = vshrl.u32 %v838_v4, 7 }
  0x40   :  { %1086 = vmatmul.mubr.msk.f32.vlgmr.msra.gmra.mxu0 %vm104_vm2, %v91_v6  ;;  %1110 = vmatprep.subr.mxu0 %v1319_v0  ;;  %v740_v6 = vld [vmem:[#allocation2] sm:$0x1] }
  0x41   :  { %1118 = vmatprep.mubr.msk.f32.mxu0 %vm1320_vm0, %v1319_v0  ;;  %1111 = vmatpush3.msra.mxu0 %v1433_v7 }
  0x42   :  { %1112 = vmatprep.subr.mxu0 %v1319_v0  ;;  %824 = vrot.lane.b32.xlu0 %v1022_v61, %s1321_s25 }
  0x43   :  { %1113 = vmatpush3.msra.mxu0 %v1438_v8 }
  0x44   :  { %1114 = vmatprep.subr.mxu0 %v1319_v0 }
  0x45   :  { %1115 = vmatpush3.msra.mxu0 %v1446_v9 }
  0x46   :  { %1116 = vmatprep.subr.mxu0 %v1319_v0 }
  0x47   :  { %1117 = vmatpush3.msra.mxu0 %v1455_v10 }
  0x48   :  { %1132 = vmatprep.subr.mxu0 %v1319_v0 }
 0x100   :  { %v178_v12 = vpop.f32.mrf.mxu0 }
 0x101   :  { %v1469_v13 = vadd.f32 %v1011_v11, %v178_v12 }
 0x102   :  { %v1087_v14 = vpop.f32.mrf.mxu0 }
 0x103   :  { %1197 = vtanh.f32 %v1469_v13  ;;  %v873_v14 = vpop.permute.xlu1 %872 }
 0x110   :  { %v1198_v15 = vpop.eup %1197 }
 0x111   :  { %1097 = vmatmul.mubr.msk.f32.vlgmr.msra.gmra.mxu1 %vm183_vm3, %v1198_v15 }
 0x112   :  { %1100 = vmatpush3.msra.mxu1 %v1433_v7  ;;  %1107 = vmatprep.mubr.msk.f32.mxu1 %vm1320_vm0, %v1319_v0 }
 0x113   :  { %1101 = vmatprep.subr.mxu1 %v1319_v0 }
 0x114   :  { %1102 = vmatpush3.msra.mxu1 %v1438_v8 }
 0x115   :  { %1103 = vmatprep.subr.mxu1 %v1319_v0 }
 0x116   :  { %1104 = vmatpush3.msra.mxu1 %v1446_v9 }
 0x117   :  { %1105 = vmatprep.subr.mxu1 %v1319_v0 }
 0x118   :  { %1106 = vmatpush3.msra.mxu1 %v1455_v10 }
 0x119   :  { %1121 = vmatprep.subr.mxu1 %v1319_v0 }
 0x1d1   :  { %v253_v16 = vpop.f32.mrf.mxu1 }
 0x1d2   :  { %v258_v17 = vrot.slane %v253_v16, 7 }
 0x1d3   :  { %v1098_v18 = vpop.f32.mrf.mxu1 }
 0x1d4   :  { %v260_v19 = vadd.f32 %v258_v17, %v1469_v13 }
 0x1d6   :  { %1199 = vtanh.f32 %v260_v19 }
 0x1e3   :  { %v1200_v20 = vpop.eup %1199 }
 0x1e4   :  { %v263_v21 = vrot.slane %v1200_v20, 1 }
 0x1e6   :  { %1108 = vmatmul.mubr.msk.f32.vlgmr.msra.gmra.mxu1 %vm183_vm3, %v263_v21 }
 0x1e7   :  { %1122 = vmatpush3.msra.mxu1 %v1433_v7  ;;  %1129 = vmatprep.mubr.msk.f32.mxu1 %vm1320_vm0, %v1319_v0 }
 0x1e8   :  { %1123 = vmatprep.subr.mxu1 %v1319_v0 }
 0x1e9   :  { %1124 = vmatpush3.msra.mxu1 %v1438_v8 }
 0x1ea   :  { %1125 = vmatprep.subr.mxu1 %v1319_v0 }
 0x1eb   :  { %1126 = vmatpush3.msra.mxu1 %v1446_v9 }
 0x1ec   :  { %1127 = vmatprep.subr.mxu1 %v1319_v0 }
 0x1ed   :  { %1128 = vmatpush3.msra.mxu1 %v1455_v10 }
 0x1ee   :  { %1143 = vmatprep.subr.mxu1 %v1319_v0 }
 0x2a6   :  { %v332_v22 = vpop.f32.mrf.mxu1 }
 0x2a7   :  { %v337_v23 = vrot.slane %v332_v22, 6  ;;  %v825_v22 = vpop.permute.xlu0 %824 }
 0x2a8   :  { %v1109_v24 = vpop.f32.mrf.mxu1 }
 0x2a9   :  { %v339_v25 = vadd.f32 %v337_v23, %v1469_v13 }
 0x2ab   :  { %1201 = vtanh.f32 %v339_v25 }
 0x2b8   :  { %v1202_v26 = vpop.eup %1201 }
 0x2b9   :  { %v342_v27 = vrot.slane %v1202_v26, 2 }
 0x2bb   :  { %1119 = vmatmul.mubr.msk.f32.vlgmr.msra.gmra.mxu0 %vm183_vm3, %v342_v27  ;;  %v835_v27 = vsub.f32 0.0, %v834_v60 }
 0x2bc   :  { %1133 = vmatpush3.msra.mxu0 %v1433_v7  ;;  %1140 = vmatprep.mubr.msk.f32.mxu0 %vm1320_vm0, %v1319_v0 }
 0x2bd   :  { %1134 = vmatprep.subr.mxu0 %v1319_v0 }
 0x2be   :  { %1135 = vmatpush3.msra.mxu0 %v1438_v8 }
 0x2bf   :  { %1136 = vmatprep.subr.mxu0 %v1319_v0 }
 0x2c0   :  { %1137 = vmatpush3.msra.mxu0 %v1446_v9 }
 0x2c1   :  { %1138 = vmatprep.subr.mxu0 %v1319_v0 }
 0x2c2   :  { %1139 = vmatpush3.msra.mxu0 %v1455_v10 }
 0x2c3   :  { %1154 = vmatprep.subr.mxu0 %v1319_v0 }
 0x37b   :  { %v411_v28 = vpop.f32.mrf.mxu0 }
 0x37c   :  { %v416_v29 = vrot.slane %v411_v28, 5  ;;  %v836_v28 = vmul.f32 1.442695, %v835_v27 }
 0x37d   :  { %v1120_v30 = vpop.f32.mrf.mxu0 }
 0x37e   :  { %v418_v31 = vadd.f32 %v416_v29, %v1469_v13  ;;  %v833_v29 = vld [vmem:[%s1588_s6] sm:$0xff] }
 0x380   :  { %1203 = vtanh.f32 %v418_v31 }
 0x38d   :  { %v1204_v32 = vpop.eup %1203 }
 0x38e   :  { %v421_v33 = vrot.slane %v1204_v32, 3 }
 0x390   :  { %1130 = vmatmul.mubr.msk.f32.vlgmr.msra.gmra.mxu1 %vm183_vm3, %v421_v33 }
 0x391   :  { %1144 = vmatpush3.msra.mxu1 %v1433_v7  ;;  %1151 = vmatprep.mubr.msk.f32.mxu1 %vm1320_vm0, %v1319_v0 }
 0x392   :  { %1145 = vmatprep.subr.mxu1 %v1319_v0 }
 0x393   :  { %1146 = vmatpush3.msra.mxu1 %v1438_v8 }
 0x394   :  { %1147 = vmatprep.subr.mxu1 %v1319_v0 }
 0x395   :  { %1148 = vmatpush3.msra.mxu1 %v1446_v9 }
 0x396   :  { %1149 = vmatprep.subr.mxu1 %v1319_v0 }
 0x397   :  { %1150 = vmatpush3.msra.mxu1 %v1455_v10 }
 0x398   :  { %1165 = vmatprep.subr.mxu1 %v1319_v0 }
 0x450   :  { %v490_v34 = vpop.f32.mrf.mxu1 }
 0x451   :  { %v495_v35 = vrot.slane %v490_v34, 4 }
 0x452   :  { %v1131_v36 = vpop.f32.mrf.mxu1 }
 0x453   :  { %v497_v37 = vadd.f32 %v495_v35, %v1469_v13 }
 0x455   :  { %1205 = vtanh.f32 %v497_v37 }
 0x462   :  { %v1206_v38 = vpop.eup %1205 }
 0x463   :  { %v500_v39 = vrot.slane %v1206_v38, 4 }
 0x465   :  { %1141 = vmatmul.mubr.msk.f32.vlgmr.msra.gmra.mxu0 %vm183_vm3, %v500_v39 }
 0x466   :  { %1155 = vmatpush3.msra.mxu0 %v1433_v7  ;;  %1162 = vmatprep.mubr.msk.f32.mxu0 %vm1320_vm0, %v1319_v0  ;;  %v925_v7 = vld [vmem:[#allocation7] sm:$0x1] }
 0x467   :  { %1156 = vmatprep.subr.mxu0 %v1319_v0 }
 0x468   :  { %1157 = vmatpush3.msra.mxu0 %v1438_v8  ;;  %v840_v8 = vsub.s32 0, %v839_v5 }
 0x469   :  { %1158 = vmatprep.subr.mxu0 %v1319_v0 }
 0x46a   :  { %1159 = vmatpush3.msra.mxu0 %v1446_v9 }
 0x46b   :  { %1160 = vmatprep.subr.mxu0 %v1319_v0 }
 0x46c   :  { %1161 = vmatpush3.msra.mxu0 %v1455_v10 }
 0x46d   :  { %1176 = vmatprep.subr.mxu0 %v1319_v0 }
 0x525   :  { %v569_v40 = vpop.f32.mrf.mxu0 }
 0x526   :  { %v574_v41 = vrot.slane %v569_v40, 3 }
 0x527   :  { %v1142_v42 = vpop.f32.mrf.mxu0 }
 0x528   :  { %v576_v43 = vadd.f32 %v574_v41, %v1469_v13 }
 0x52a   :  { %1207 = vtanh.f32 %v576_v43 }
 0x537   :  { %v1208_v44 = vpop.eup %1207 }
 0x538   :  { %v579_v45 = vrot.slane %v1208_v44, 5 }
 0x53a   :  { %1152 = vmatmul.mubr.msk.f32.vlgmr.msra.gmra.mxu1 %vm183_vm3, %v579_v45 }
 0x53b   :  { %1173 = vmatprep.mubr.msk.f32.mxu1 %vm1320_vm0, %v1319_v0  ;;  %1166 = vmatpush3.msra.mxu1 %v739_v52 }
 0x53c   :  { %1167 = vmatprep.subr.mxu1 %v1319_v0 }
 0x53d   :  { %1168 = vmatpush3.msra.mxu1 %v738_v54 }
 0x53e   :  { %1169 = vmatprep.subr.mxu1 %v1319_v0 }
 0x53f   :  { %1170 = vmatpush3.msra.mxu1 %v737_v56 }
 0x540   :  { %1171 = vmatprep.subr.mxu1 %v1319_v0 }
 0x541   :  { %1172 = vmatpush3.msra.mxu1 %v736_v58 }
 0x5fa   :  { %v648_v46 = vpop.f32.mrf.mxu1 }
 0x5fb   :  { %v653_v47 = vrot.slane %v648_v46, 2 }
 0x5fc   :  { %v1153_v48 = vpop.f32.mrf.mxu1 }
 0x5fd   :  { %v655_v49 = vadd.f32 %v653_v47, %v1469_v13 }
 0x5ff   :  { %1209 = vtanh.f32 %v655_v49 }
 0x60c   :  { %v1210_v50 = vpop.eup %1209 }
 0x60d   :  { %v658_v51 = vrot.slane %v1210_v50, 6 }
 0x60f   :  { %1163 = vmatmul.mubr.msk.f32.vlgmr.msra.gmra.mxu0 %vm183_vm3, %v658_v51 }
 0x610   :  { %1184 = vmatprep.mubr.msk.f32.mxu0 %vm1320_vm0, %v1319_v0  ;;  %1177 = vmatpush3.msra.mxu0 %v924_v53 }
 0x611   :  { %1178 = vmatprep.subr.mxu0 %v1319_v0 }
 0x612   :  { %1179 = vmatpush3.msra.mxu0 %v923_v55 }
 0x613   :  { %1180 = vmatprep.subr.mxu0 %v1319_v0 }
 0x614   :  { %1181 = vmatpush3.msra.mxu0 %v922_v57 }
 0x615   :  { %1182 = vmatprep.subr.mxu0 %v1319_v0 }
 0x616   :  { %1183 = vmatpush3.msra.mxu0 %v921_v59 }
 0x6cf   :  { %v727_v62 = vpop.f32.mrf.mxu0 }
 0x6d0   :  { %v732_v63 = vrot.slane %v727_v62, 1 }
 0x6d1   :  { %v1164_v1 = vpop.f32.mrf.mxu0 }
 0x6d2   :  { %v734_v0 = vadd.f32 %v732_v63, %v1469_v13 }
 0x6d4   :  { %1211 = vtanh.f32 %v734_v0 }
 0x6e1   :  { %v1212_v2 = vpop.eup %1211 }
 0x6e2   :  { %v742_v3 = vrot.slane %v1212_v2, 7 }
 0x6e4   :  { %1174 = vmatmul.mubr.msk.f32.vlgmr.msra.gmra.mxu1 %vm183_vm3, %v742_v3  ;;  %1185 = vmatmul.mubr.msk.f32.vlgmr.msra.gmra.mxu0 %vm183_vm3, %v742_v3 }
 0x7a4   :  { %v811_v9 = vpop.f32.mrf.mxu1  ;;  %v992_v10 = vpop.f32.mrf.mxu0 }
 0x7a5   :  { %v812_v11 = vadd.f32 %v811_v9, %v740_v6  ;;  %v993_v12 = vadd.f32 %v992_v10, %v925_v7 }
 0x7a6   :  { %v1175_v15 = vpop.f32.mrf.mxu1  ;;  %v1186_v16 = vpop.f32.mrf.mxu0 }
 0x7a7   :  { %v815_v13 = vmul.f32 0.5, %v812_v11  ;;  %1213 = vtanh.f32 %v993_v12  ;;  %v870_v17 = vrot.slane %v812_v11, %v840_v8  ;;  %v887_v26 = vadd.f32 1.0, %v812_v11 }
 0x7a9   :  { %v816_v18 = vmul.f32 1.442695, %v815_v13  ;;  %v875_v19 = vsub.f32 %v870_v17, %v873_v14  ;;  %v883_v30 = vsub.f32 %v870_v17, %v833_v29 }
 0x7ab   :  { %1215 = vpow2.f32 %v816_v18  ;;  %v876_v20 = vmul.f32 1.442695, %v875_v19  ;;  %v884_v32 = vmul.f32 %v883_v30, %v883_v30 }
 0x7ad   :  { %1217 = vpow2.f32 %v876_v20 }
 0x7ae   :  { %1219 = vpow2.f32 %v836_v28 }
 0x7b4   :  { %v1214_v21 = vpop.eup %1213 }
 0x7b5   :  { %999 = vst.msk [vmem:[%s1593_s11] sm:$0x1] %vm998_vm4, %v1214_v21 }
 0x7b8   :  { %v1216_v23 = vpop.eup %1215 }
 0x7b9   :  { %v827_v24 = vmul.f32 %v1216_v23, %v825_v22 }
 0x7ba   :  { %v1218_v25 = vpop.eup %1217 }
 0x7bb   :  { %829 = vrot.lane.b32.xlu0 %v827_v24, %s1322_s26  ;;  %v1220_v34 = vpop.eup %1219 }
 0x7bc   :  { %v885_v38 = vmul.f32 %v1220_v34, %v884_v32 }
 0x7bf   :  { %879 = vrot.lane.b32.xlu0 %v1218_v25, %s1322_s26 }
 0x7c3   :  { %889 = vrot.lane.b32.xlu0 %v887_v26, %s1322_s26 }
 0x82d   :  { %v830_v31 = vpop.permute.xlu0 %829 }
 0x82e   :  { %v832_v33 = vadd.f32 %v830_v31, %v812_v11 }
 0x830   :  { %v841_v35 = vrot.slane %v832_v33, %v840_v8  ;;  %1000 = vst.msk [vmem:[%s1593_s11 + $0x1] sm:$0x1] %vm892_vm5, %v832_v33 }
 0x831   :  { %v880_v36 = vpop.permute.xlu0 %879 }
 0x832   :  { %v842_v37 = vsub.f32 %v841_v35, %v833_v29  ;;  %v882_v39 = vadd.f32 %v880_v36, %v834_v60 }
 0x834   :  { %v886_v40 = vadd.f32 %v885_v38, %v882_v39  ;;  %v843_v41 = vmul.f32 %v842_v37, %v842_v37 }
 0x835   :  { %v890_v44 = vpop.permute.xlu0 %889 }
 0x836   :  { %v844_v42 = vmul.f32 %v1220_v34, %v843_v41  ;;  %v893_v45 = vsel %vm892_vm5, %v890_v44, 0.0 }
 0x838   :  { %v845_v43 = vsel %vm183_vm3, %v844_v42, 0.0 }
 0x839   :  { %846 = vadd.xlane.f32.xlu1 %v845_v43 }
 0x83d   :  { %894 = vadd.xlane.f32.xlu1 %v893_v45 }
 0x8c2   :  { %v847_v46 = vpop.xlane.xlu1 %846 }
 0x8c3   :  { %v848_v47 = vsub.f32 0.0, %v847_v46 }
 0x8c5   :  { %v849_v48 = vrot.slane %v848_v47, 4 }
 0x8c6   :  { %v895_v18 = vpop.xlane.xlu1 %894 }
 0x8c7   :  { %v850_v49 = vmax.f32 %v848_v47, %v849_v48  ;;  %v897_v20 = vmul.f32 0.03125, %v895_v18 }
 0x8c9   :  { %v851_v50 = vrot.slane %v850_v49, 2  ;;  %v898_v23 = vmul.f32 0.5, %v897_v20 }
 0x8cb   :  { %v852_v51 = vmax.f32 %v850_v49, %v851_v50 }
 0x8cd   :  { %v853_v52 = vrot.slane %v852_v51, 1 }
 0x8cf   :  { %v854_v53 = vmax.f32 %v852_v51, %v853_v52 }
 0x8d1   :  { %v855_v54 = vsub.f32 %v848_v47, %v854_v53 }
 0x8d3   :  { %v856_v55 = vmul.f32 1.442695, %v855_v54 }
 0x8d5   :  { %1221 = vpow2.f32 %v856_v55 }
 0x8e2   :  { %v1222_v56 = vpop.eup %1221 }
 0x8e3   :  { %v858_v57 = vrot.slane %v1222_v56, 4 }
 0x8e5   :  { %v859_v58 = vadd.f32 %v1222_v56, %v858_v57 }
 0x8e7   :  { %v860_v59 = vrot.slane %v859_v58, 2 }
 0x8e9   :  { %v861_v60 = vadd.f32 %v860_v59, %v859_v58 }
 0x8eb   :  { %v862_v61 = vrot.slane %v861_v60, 1 }
 0x8ed   :  { %v863_v62 = vadd.f32 %v862_v61, %v861_v60 }
 0x8ef   :  { %1223 = vrcp.f32 %v863_v62 }
 0x8fc   :  { %v1224_v63 = vpop.eup %1223 }
 0x8fd   :  { %v865_v1 = vmul.f32 %v1224_v63, %v1222_v56 }
 0x8ff   :  { %v866_v0 = vadd.f32 1e-10, %v865_v1 }
 0x901   :  { %v899_v2 = vmul.f32 %v886_v40, %v866_v0  ;;  %1225 = vlog2.f32 %v866_v0 }
 0x903   :  { %v900_v3 = vsel %vm183_vm3, %v899_v2, 0.0 }
 0x904   :  { %901 = vadd.xlane.f32.xlu0 %v900_v3 }
 0x90e   :  { %v1226_v4 = vpop.eup %1225 }
 0x90f   :  { %v912_v5 = vmul.f32 0.6931472, %v1226_v4 }
 0x911   :  { %v913_v6 = vmul.f32 %v912_v5, %v866_v0 }
 0x913   :  { %v914_v7 = vrot.slane %v913_v6, 4 }
 0x915   :  { %v915_v8 = vadd.f32 %v914_v7, %v913_v6 }
 0x917   :  { %v916_v9 = vrot.slane %v915_v8, 2 }
 0x919   :  { %v917_v10 = vadd.f32 %v916_v9, %v915_v8 }
 0x91b   :  { %v918_v11 = vrot.slane %v917_v10, 1 }
 0x91d   :  { %v919_v12 = vadd.f32 %v918_v11, %v917_v10 }
 0x91f   :  { %v920_v14 = vmul.f32 0.125, %v919_v12 }
 0x921   :  { %1003 = vst.msk [vmem:[%s1593_s11 + $0x3] sm:$0x1] %vm1001_vm6, %v920_v14 }
 0x98d   :  { %v902_v15 = vpop.xlane.xlu0 %901 }
 0x98e   :  { %v903_v16 = vrot.slane %v902_v15, 4 }
 0x990   :  { %v904_v13 = vadd.f32 %v903_v16, %v902_v15 }
 0x992   :  { %v905_v17 = vrot.slane %v904_v13, 2 }
 0x994   :  { %v906_v19 = vadd.f32 %v905_v17, %v904_v13 }
 0x996   :  { %v907_v21 = vrot.slane %v906_v19, 1 }
 0x998   :  { %v908_v22 = vadd.f32 %v907_v21, %v906_v19 }
 0x99a   :  { %v909_v24 = vmul.f32 0.5, %v908_v22 }
 0x99c   :  { %v910_v25 = vsub.f32 %v909_v24, %v898_v23 }
 0x99e   :  { %1002 = vst.msk [vmem:[%s1593_s11 + $0x2] sm:$0x1] %vm1001_vm6, %v910_v25 }
 0x99f   :  { %1008 = vsyncpa [#allocation3], 1 }
 0x9a0   :  { %1009 = vsyncpa [#allocation5], 1 }
 0x9a1   :  { %1010 = vsyncpa [#allocation8], 1 }

</bundles_post_ra>
